<compile_context>
chip_gen: v6e
topology: v6e:2x2x1
jax: 0.10.0
libtpu: 0.0.40
codegen_flags: <defaults>
</compile_context>

<pallas_src>
import functools

import jax
import jax.numpy as jnp
import numpy as np
from jax.experimental import pallas as pl
from jax.experimental.pallas import tpu as pltpu


# ---------------------------------------------------------------------------
# Small helpers
# ---------------------------------------------------------------------------
def _round_up(n, m):
    return (n + m - 1) // m * m


def _cdiv(a, b):
    return (a + b - 1) // b


def _vmem_capacity_bytes():
    try:
        info = pltpu.get_tpu_info()
        for attr in ("vmem_capacity_bytes", "vmem_bytes"):
            cap = getattr(info, attr, None)
            if cap:
                return int(cap)
    except Exception:
        pass
    return 64 * 1024 * 1024  # conservative fallback: v7x per-TC VMEM


_VMEM_CAP = _vmem_capacity_bytes()
_MAX_TILE_B = 2048        # upper bound on batch tile (amortizes ~0.35us/step)
_SPLIT_MIN_CHUNK = 64     # below this the per-model grid is overhead-bound


def _resident_spec(block_shape, index_map):
    """BlockSpec for a block whose index never changes across the grid:
    single-buffer it (double-buffering a constant block only wastes VMEM)."""
    try:
        return pl.BlockSpec(block_shape, index_map, pipeline_mode=pl.Buffered(1))
    except Exception:  # jax version without pipeline_mode= — fall back safely
        return pl.BlockSpec(block_shape, index_map)


# ---------------------------------------------------------------------------
# Kernels
# ---------------------------------------------------------------------------
def _fused_linear_kernel(x_ref, w_ref, b_ref, out_ref):
    """out = x_tile @ W + b.  W pre-transposed (Dp, Np); Np lane-dense."""
    w = w_ref[...]
    x = x_ref[...].astype(w.dtype)   # per-tile cast: bf16 path adds no HBM pass
    y = jnp.dot(x, w, preferred_element_type=jnp.float32)
    out_ref[...] = (y + b_ref[...]).astype(out_ref.dtype)


def _split_linear_kernel(x_ref, w_ref, b_ref, out_ref):
    """One grid step = one (model, batch-tile): out = x_tile @ W[m] + b[m]."""
    w = w_ref[0]                      # (Dp, C) — true class width, no HBM pad
    x = x_ref[0].astype(w.dtype)      # (TILE_B, Dp)
    y = jnp.dot(x, w, preferred_element_type=jnp.float32)
    out_ref[0] = (y + b_ref[0]).astype(out_ref.dtype)


# ---------------------------------------------------------------------------
# pallas_call wrappers
# ---------------------------------------------------------------------------
def _fused_matmul(x, w, b):
    """x:(B,Dp) @ w:(Dp,Np) + b:(1,Np) -> (B,Np) f32.  Dp%128==0, Np%128==0."""
    Bx, Dp = x.shape
    Np = w.shape[1]
    x_sz = np.dtype(x.dtype).itemsize
    w_sz = np.dtype(w.dtype).itemsize

    # VMEM-aware batch-tile cap: 2x double-buffered x tiles + resident W/bias
    # + 2x out tiles (+ cast temp if dtypes differ) under ~70% of capacity.
    budget = int(0.70 * _VMEM_CAP)
    w_bytes = Dp * Np * w_sz + Np * 4          # single-buffered (resident)
    per_row = 2 * Dp * x_sz + 2 * Np * 4
    if x.dtype != w.dtype:
        per_row += Dp * w_sz                    # in-kernel cast temporary
    tile_cap = max(8, min(_MAX_TILE_B, (budget - w_bytes) // max(per_row, 1)))
    tile_cap = max(8, tile_cap // 8 * 8)

    # Balanced tiles -> minimal (usually zero) batch padding, no wasted tiles.
    n_tiles = max(1, _cdiv(Bx, tile_cap))
    tile_b = _round_up(_cdiv(Bx, n_tiles), 8)
    Bp = n_tiles * tile_b
    if Bp != Bx:
        x = jnp.pad(x, ((0, Bp - Bx), (0, 0)))

    need = 2 * tile_b * Dp * x_sz + w_bytes + 2 * tile_b * Np * 4
    vmem_limit = int(min(0.85 * _VMEM_CAP, max(need + (16 << 20), 32 << 20)))

    out = pl.pallas_call(
        _fused_linear_kernel,
        out_shape=jax.ShapeDtypeStruct((Bp, Np), jnp.float32),
        grid_spec=pltpu.PrefetchScalarGridSpec(
            num_scalar_prefetch=0,
            grid=(n_tiles,),
            in_specs=[
                pl.BlockSpec((tile_b, Dp), lambda i: (i, 0)),
                _resident_spec((Dp, Np), lambda i: (0, 0)),   # weights resident
                _resident_spec((1, Np), lambda i: (0, 0)),
            ],
            out_specs=pl.BlockSpec((tile_b, Np), lambda i: (i, 0)),
        ),
        # TODO(synk): verify in xprof that the batch axis shards across both
        # v7x TensorCores; if not, switch to pltpu.CORE_PARALLEL / pl.core_map.
        compiler_params=pltpu.CompilerParams(
            dimension_semantics=("parallel",),
            vmem_limit_bytes=vmem_limit,
        ),
    )(x, w, b)
    return out[:Bx] if Bp != Bx else out


def _stack_all_models(x2d, Wt, bias_f32, compute_dtype):
    """All M models fused into ONE lane-dense matmul: (B,Dp)@(Dp,M*C)->(M,B,C)."""
    M, Dp, C = Wt.shape
    B = x2d.shape[0]
    N = M * C
    Np = _round_up(N, 128)
    # W_all[d, m*C + c] = W[m, c, d]  (weights tiny relative to x; reshuffle freely)
    w_all = jnp.transpose(Wt, (1, 0, 2)).reshape(Dp, N)
    w_all = jnp.pad(w_all, ((0, 0), (0, Np - N))).astype(compute_dtype)
    b_all = jnp.pad(bias_f32.reshape(N), ((0, Np - N),)).reshape(1, Np)
    out = _fused_matmul(x2d, w_all, b_all)                     # (B, Np)
    out = out[:, :N].reshape(B, M, C)
    return jnp.transpose(out, (1, 0, 2))                       # (M, B, C)


def _split_forward(x3, Wt, bias_f32, compute_dtype):
    """x3:(M,chunk,Dp), Wt:(M,Dp,C) -> (M,chunk,C) f32.

    grid = (model, batch-tile): model axis OUTER so each model's weight slab is
    DMA'd once; inner batch tiles pipeline x DMAs against the MXU and keep VMEM
    bounded independently of batch size.
    """
    M, chunk, Dp = x3.shape
    C = Wt.shape[2]
    Cl = _round_up(C, 128)            # VMEM lane-padded width (layout, not HBM)
    x_sz = np.dtype(x3.dtype).itemsize
    w_sz = np.dtype(compute_dtype).itemsize

    # W at true class width: cuts per-model weight HBM DMA ~12.8x vs padding
    # C->128 in HBM; the tiny (TILE_B, C) output store is masked, which is fine.
    w = Wt.astype(compute_dtype)                              # (M, Dp, C)
    b = bias_f32.reshape(M, 1, C)

    budget = int(0.70 * _VMEM_CAP)
    w_bytes = 2 * Dp * Cl * w_sz                              # double-buffered
    per_row = 2 * Dp * x_sz + 2 * Cl * 4
    if x3.dtype != w.dtype:
        per_row += Dp * w_sz
    tile_cap = max(8, min(512, (budget - w_bytes) // max(per_row, 1)))
    tile_cap = max(8, tile_cap // 8 * 8)

    n_tiles = max(1, _cdiv(chunk, tile_cap))
    tile_b = _round_up(_cdiv(chunk, n_tiles), 8)
    chunk_p = n_tiles * tile_b
    if chunk_p != chunk:
        x3 = jnp.pad(x3, ((0, 0), (0, chunk_p - chunk), (0, 0)))

    need = 2 * tile_b * Dp * x_sz + w_bytes + 2 * tile_b * Cl * 4
    vmem_limit = int(min(0.85 * _VMEM_CAP, max(need + (16 << 20), 32 << 20)))

    out = pl.pallas_call(
        _split_linear_kernel,
        out_shape=jax.ShapeDtypeStruct((M, chunk_p, C), jnp.float32),
        grid_spec=pltpu.PrefetchScalarGridSpec(
            num_scalar_prefetch=0,
            grid=(M, n_tiles),        # model outer -> weights fetched once/model
            in_specs=[
                pl.BlockSpec((1, tile_b, Dp), lambda m, i: (m, i, 0)),
                pl.BlockSpec((1, Dp, C), lambda m, i: (m, 0, 0)),
                pl.BlockSpec((1, 1, C), lambda m, i: (m, 0, 0)),
            ],
            out_specs=pl.BlockSpec((1, tile_b, C), lambda m, i: (m, i, 0)),
        ),
        # TODO(synk): verify 2-TC sharding on v7x; use CORE_PARALLEL if needed.
        compiler_params=pltpu.CompilerParams(
            dimension_semantics=("parallel", "parallel"),
            vmem_limit_bytes=vmem_limit,
        ),
    )(x3, w, b)
    return out[:, :chunk, :] if chunk_p != chunk else out


# ---------------------------------------------------------------------------
# Ensemble.forward
# ---------------------------------------------------------------------------
@functools.partial(jax.jit, static_argnames=("average", "split", "compute_dtype"))
def ensemble_forward(x_nchw, W, b, *, average=False, split=False,
                     compute_dtype=None):
    """
    x_nchw: (B, C, H, W)
    W:      (M, num_classes, D) with D = C*H*W   (stacked per-model weights)
    b:      (M, 1, num_classes)

    average=False, split=False -> (M, B, num_classes)
    average=True,  split=False -> (B, num_classes)
    average=False, split=True  -> (M, B//M, num_classes)
    average=True,  split=True  -> (B//M, num_classes)

    compute_dtype: dtype fed to the MXU (None -> x dtype).  x is cast per VMEM
    tile inside the kernel, so requesting bf16 never adds an HBM pass over x.
    """
    # TODO(synk): Ensemble wraps arbitrary nn.Modules; sub-models are realized
    # here as linear classifiers (flatten -> logits). `progress` (tqdm) is a
    # host-side UI concern with no kernel equivalent.
    M, C_out, D = W.shape
    B = x_nchw.shape[0]
    cd = (np.dtype(compute_dtype) if compute_dtype is not None
          else np.dtype(x_nchw.dtype))

    x = x_nchw.reshape(B, D)                     # torch: x.view(B, -1)

    # Pad the contraction dim ONLY when misaligned (CIFAR D=3072 needs no pad
    # -> no extra HBM pass over x).
    Dp = _round_up(D, 128)
    if Dp != D:
        x = jnp.pad(x, ((0, 0), (0, Dp - D)))

    # Weights are tiny relative to x: transpose/pad/cast them freely so the
    # kernels never transpose on the MXU path.
    Wt = jnp.transpose(W, (0, 2, 1))             # (M, D, C)
    if Dp != D:
        Wt = jnp.pad(Wt, ((0, 0), (0, Dp - D), (0, 0)))
    bias = b.reshape(M, C_out).astype(jnp.float32)

    if not split:
        if average:
            # mean_m(x @ W[m].T + b[m]) == x @ mean_m(W).T + mean_m(b):
            # fold the model mean into the weights -> ONE matmul, Mx fewer FLOPs.
            Np = _round_up(C_out, 128)
            w_eff = jnp.mean(Wt.astype(jnp.float32), axis=0)            # (Dp, C)
            w_eff = jnp.pad(w_eff, ((0, 0), (0, Np - C_out))).astype(cd)
            b_eff = jnp.pad(jnp.mean(bias, axis=0),
                            ((0, Np - C_out),)).reshape(1, Np)
            out = _fused_matmul(x, w_eff, b_eff)                        # (B, Np)
            return out[:, :C_out]
        # Stack all M models into ONE lane-dense matmul x @ W_all -> (M, B, C).
        return _stack_all_models(x, Wt, bias, cd)

    # ---- split=True: model m sees only its own contiguous batch chunk -------
    assert B % M == 0, "batch must divide evenly across models when split=True"
    chunk = B // M

    if chunk < _SPLIT_MIN_CHUNK:
        # Tiny per-model chunks under-fill the MXU and are dominated by
        # per-grid-step overhead: run the single fused matmul over the whole
        # (small) batch instead and gather each model's own chunk.
        stacked = _stack_all_models(x, Wt, bias, cd)          # (M, B, C)
        stacked = stacked.reshape(M, M, chunk, C_out)
        out = stacked[jnp.arange(M), jnp.arange(M)]           # (M, chunk, C)
    else:
        out = _split_forward(x.reshape(M, chunk, Dp), Wt, bias, cd)

    # Different models see different chunks -> the mean cannot be folded into
    # the weights; the (M, B//M, C) reduce is tiny -> plain JAX.
    return jnp.mean(out, axis=0) if average else out


# ---------------------------------------------------------------------------
# Demo / self-check
# ---------------------------------------------------------------------------
if __name__ == "__main__":
    M = 4                       # number of models in the ensemble
    C_in, H, Wd = 4, 8, 8       # D = 256 (lane-aligned -> no pad pass over x)
    D = C_in * H * Wd
    NUM_CLASSES = 10

    key = jax.random.PRNGKey(0)
    kx, kw, kb, kx2 = jax.random.split(key, 4)

    W = 0.02 * jax.random.normal(kw, (M, NUM_CLASSES, D), dtype=jnp.float32)
    bias = 0.1 * jax.random.normal(kb, (M, 1, NUM_CLASSES), dtype=jnp.float32)

    def reference(xf, split, average):
        """Pure-JAX mirror of the PyTorch Ensemble.forward semantics."""
        if split:
            xs = jnp.split(xf, M, axis=0)
            outs = jnp.stack([xs[m] @ W[m].T + bias[m, 0] for m in range(M)])
        else:
            outs = jnp.stack([xf @ W[m].T + bias[m, 0] for m in range(M)])
        return jnp.mean(outs, axis=0) if average else outs

    # --- small batch: fused stack / folded-mean / small-chunk split fallback --
    B = 32
    x = jax.random.normal(kx, (B, C_in, H, Wd), dtype=jnp.float32)
    xf = x.reshape(B, -1)

    out_stack = jax.block_until_ready(ensemble_forward(x, W, bias))
    out_avg = jax.block_until_ready(ensemble_forward(x, W, bias, average=True))
    out_split = jax.block_until_ready(ensemble_forward(x, W, bias, split=True))
    out_split_avg = jax.block_until_ready(
        ensemble_forward(x, W, bias, average=True, split=True))

    assert out_stack.shape == (M, B, NUM_CLASSES)
    assert out_avg.shape == (B, NUM_CLASSES)
    assert out_split.shape == (M, B // M, NUM_CLASSES)
    assert out_split_avg.shape == (B // M, NUM_CLASSES)

    np.testing.assert_allclose(np.asarray(out_stack),
                               np.asarray(reference(xf, False, False)),
                               rtol=1e-4, atol=1e-5)
    np.testing.assert_allclose(np.asarray(out_avg),
                               np.asarray(reference(xf, False, True)),
                               rtol=1e-4, atol=1e-5)
    np.testing.assert_allclose(np.asarray(out_split),
                               np.asarray(reference(xf, True, False)),
                               rtol=1e-4, atol=1e-5)
    np.testing.assert_allclose(np.asarray(out_split_avg),
                               np.asarray(reference(xf, True, True)),
                               rtol=1e-4, atol=1e-5)

    # --- larger batch: exercises the tiled (model x batch-tile) split kernel --
    B2 = M * _SPLIT_MIN_CHUNK    # 256 -> chunk = 64 per model
    x2 = jax.random.normal(kx2, (B2, C_in, H, Wd), dtype=jnp.float32)
    xf2 = x2.reshape(B2, -1)
    out_split2 = jax.block_until_ready(ensemble_forward(x2, W, bias, split=True))
    assert out_split2.shape == (M, B2 // M, NUM_CLASSES)
    np.testing.assert_allclose(np.asarray(out_split2),
                               np.asarray(reference(xf2, True, False)),
                               rtol=1e-4, atol=1e-5)

    # --- bf16 MXU path: x is cast per VMEM tile in-kernel (no extra HBM pass) -
    out_bf16 = jax.block_until_ready(
        ensemble_forward(x, W, bias, compute_dtype=jnp.bfloat16))
    np.testing.assert_allclose(np.asarray(out_bf16),
                               np.asarray(reference(xf, False, False)),
                               rtol=5e-2, atol=5e-2)

    print("KERNEL_OK")
</pallas_src>

<mosaic_0001>
module attributes {stable_mosaic.version = 11 : i64} {
  func.func @_fused_linear_kernel(%arg0: i32, %arg1: memref<32x256xf32, #tpu.memory_space<vmem>>, %arg2: memref<256x128xf32, #tpu.memory_space<vmem>>, %arg3: memref<1x128xf32, #tpu.memory_space<vmem>>, %arg4: memref<32x128xf32, #tpu.memory_space<vmem>>) attributes {dimension_semantics = [#tpu.dimension_semantics<parallel>], iteration_bounds = array<i64: 1>, scalar_prefetch = 0 : i64, scratch_operands = 0 : i64, tpu.core_type = #tpu.core_type<tc>, window_params = [{transform_indices = @transform_0, window_bounds = array<i64: 32, 256>}, {pipeline_mode = #tpu.pipeline_mode<synchronous>, transform_indices = @transform_1, window_bounds = array<i64: 256, 128>}, {pipeline_mode = #tpu.pipeline_mode<synchronous>, transform_indices = @transform_2, window_bounds = array<i64: 1, 128>}, {transform_indices = @transform_3, window_bounds = array<i64: 32, 128>}]} {
    %c0 = arith.constant 0 : index
    %c0_0 = arith.constant 0 : index
    %0 = vector.load %arg2[%c0, %c0_0] : memref<256x128xf32, #tpu.memory_space<vmem>>, vector<256x128xf32>
    %c0_1 = arith.constant 0 : index
    %c0_2 = arith.constant 0 : index
    %1 = vector.load %arg1[%c0_1, %c0_2] : memref<32x256xf32, #tpu.memory_space<vmem>>, vector<32x256xf32>
    %cst = arith.constant dense<0.000000e+00> : vector<32x128xf32>
    %2 = tpu.matmul %1, %0, %cst {dimension_numbers = #tpu.dot_dimension_numbers<[1], [0], [0], [1], [0, 0, 1, 1], [], []>} : vector<32x256xf32>, vector<256x128xf32>, vector<32x128xf32> -> vector<32x128xf32>
    %c0_3 = arith.constant 0 : index
    %c0_4 = arith.constant 0 : index
    %3 = vector.load %arg3[%c0_3, %c0_4] : memref<1x128xf32, #tpu.memory_space<vmem>>, vector<1x128xf32>
    %4 = vector.broadcast %3 : vector<1x128xf32> to vector<32x128xf32>
    %5 = arith.addf %2, %4 : vector<32x128xf32>
    %c0_5 = arith.constant 0 : index
    %c0_6 = arith.constant 0 : index
    %6 = vector.load %arg4[%c0_5, %c0_6] : memref<32x128xf32, #tpu.memory_space<vmem>>, vector<32x128xf32>
    tpu.vector_store %arg4[%c0_5, %c0_6], %5 {strides = array<i32>} : memref<32x128xf32, #tpu.memory_space<vmem>>, vector<32x128xf32>,
    return
  }
  func.func @transform_0(%arg0: i32) -> (i32, i32) {
    %c0_i32 = arith.constant 0 : i32
    %c0_i32_0 = arith.constant 0 : i32
    return %arg0, %c0_i32 : i32, i32
  }
  func.func @transform_1(%arg0: i32) -> (i32, i32) {
    %c0_i32 = arith.constant 0 : i32
    %c0_i32_0 = arith.constant 0 : i32
    %c0_i32_1 = arith.constant 0 : i32
    return %c0_i32, %c0_i32_0 : i32, i32
  }
  func.func @transform_2(%arg0: i32) -> (i32, i32) {
    %c0_i32 = arith.constant 0 : i32
    %c0_i32_0 = arith.constant 0 : i32
    %c0_i32_1 = arith.constant 0 : i32
    return %c0_i32, %c0_i32_0 : i32, i32
  }
  func.func @transform_3(%arg0: i32) -> (i32, i32) {
    %c0_i32 = arith.constant 0 : i32
    %c0_i32_0 = arith.constant 0 : i32
    return %arg0, %c0_i32 : i32, i32
  }
}

</mosaic_0001>

<bundles_post_ra>
// kernel: ensemble_forward.1
= control target key start
LH: loop header
LB: loop body
LE: loop exit
PB: predicated region body
PF: predicated region fallthrough
CT: control target
= control target key end

     0   :  { %s386_s1 = inlined_call_operand.vmem [shape: f32[256,128], index: 1, kind: input, shape index: {}]   ;;  %s387_s0 = inlined_call_operand.vmem [shape: f32[32,256], index: 0, kind: input, shape index: {}]   ;;  %s388_s2 = inlined_call_operand.vmem [shape: f32[1,128], index: 2, kind: input, shape index: {}]   ;;  %s389_s3 = inlined_call_operand.vmem [shape: f32[32,128], index: 3, kind: output, shape index: {}]  }
   0x1   :  { %v45_v0 = vld [vmem:[%s386_s1 + $0xf8] sm:$0xff]  ;;  %v44_v2 = vld [vmem:[%s386_s1 + $0xf0] sm:$0xff]  ;;  %v43_v4 = vld [vmem:[%s386_s1 + $0xe8] sm:$0xff] }
   0x2   :  { %v29_v1 = vld [vmem:[%s386_s1 + $0x78] sm:$0xff]  ;;  %155 = vmatprep.subr.mxu0 %v45_v0  ;;  %199 = vmatprep.subr.mxu1 %v45_v0  ;;  %v28_v3 = vld [vmem:[%s386_s1 + $0x70] sm:$0xff]  ;;  %v27_v5 = vld [vmem:[%s386_s1 + $0x68] sm:$0xff] }
   0x3   :  { %156 = vmatpush3.msra.mxu0 %v29_v1  ;;  %215 = vmatpush3.msra.mxu1 %v29_v1  ;;  %v42_v6 = vld [vmem:[%s386_s1 + $0xe0] sm:$0xff]  ;;  %v41_v8 = vld [vmem:[%s386_s1 + $0xd8] sm:$0xff]  ;;  %v40_v10 = vld [vmem:[%s386_s1 + $0xd0] sm:$0xff] }
   0x4   :  { %157 = vmatprep.subr.mxu0 %v44_v2  ;;  %200 = vmatprep.subr.mxu1 %v44_v2  ;;  %v26_v7 = vld [vmem:[%s386_s1 + $0x60] sm:$0xff]  ;;  %v25_v9 = vld [vmem:[%s386_s1 + $0x58] sm:$0xff]  ;;  %v24_v11 = vld [vmem:[%s386_s1 + $0x50] sm:$0xff] }
   0x5   :  { %158 = vmatpush3.msra.mxu0 %v28_v3  ;;  %216 = vmatpush3.msra.mxu1 %v28_v3  ;;  %v39_v12 = vld [vmem:[%s386_s1 + $0xc8] sm:$0xff]  ;;  %v38_v14 = vld [vmem:[%s386_s1 + $0xc0] sm:$0xff]  ;;  %v37_v16 = vld [vmem:[%s386_s1 + $0xb8] sm:$0xff] }
   0x6   :  { %159 = vmatprep.subr.mxu0 %v43_v4  ;;  %201 = vmatprep.subr.mxu1 %v43_v4  ;;  %v23_v13 = vld [vmem:[%s386_s1 + $0x48] sm:$0xff]  ;;  %v22_v15 = vld [vmem:[%s386_s1 + $0x40] sm:$0xff]  ;;  %v21_v17 = vld [vmem:[%s386_s1 + $0x38] sm:$0xff] }
   0x7   :  { %160 = vmatpush3.msra.mxu0 %v27_v5  ;;  %217 = vmatpush3.msra.mxu1 %v27_v5  ;;  %v36_v18 = vld [vmem:[%s386_s1 + $0xb0] sm:$0xff]  ;;  %v35_v20 = vld [vmem:[%s386_s1 + $0xa8] sm:$0xff]  ;;  %v34_v22 = vld [vmem:[%s386_s1 + $0xa0] sm:$0xff] }
   0x8   :  { %161 = vmatprep.subr.mxu0 %v42_v6  ;;  %202 = vmatprep.subr.mxu1 %v42_v6  ;;  %v20_v19 = vld [vmem:[%s386_s1 + $0x30] sm:$0xff]  ;;  %v19_v21 = vld [vmem:[%s386_s1 + $0x28] sm:$0xff]  ;;  %v18_v23 = vld [vmem:[%s386_s1 + $0x20] sm:$0xff] }
   0x9   :  { %162 = vmatpush3.msra.mxu0 %v26_v7  ;;  %218 = vmatpush3.msra.mxu1 %v26_v7  ;;  %v33_v24 = vld [vmem:[%s386_s1 + $0x98] sm:$0xff]  ;;  %v32_v26 = vld [vmem:[%s386_s1 + $0x90] sm:$0xff]  ;;  %v31_v28 = vld [vmem:[%s386_s1 + $0x88] sm:$0xff] }
   0xa   :  { %163 = vmatprep.subr.mxu0 %v41_v8  ;;  %203 = vmatprep.subr.mxu1 %v41_v8  ;;  %v17_v25 = vld [vmem:[%s386_s1 + $0x18] sm:$0xff]  ;;  %v16_v27 = vld [vmem:[%s386_s1 + $0x10] sm:$0xff]  ;;  %v15_v29 = vld [vmem:[%s386_s1 + $0x8] sm:$0xff] }
   0xb   :  { %164 = vmatpush3.msra.mxu0 %v25_v9  ;;  %219 = vmatpush3.msra.mxu1 %v25_v9  ;;  %v30_v30 = vld [vmem:[%s386_s1 + $0x80] sm:$0xff]  ;;  %v47_v32 = vld [vmem:[%s387_s0 + $0x8] sm:$0xff]  ;;  %v49_v36 = vld [vmem:[%s387_s0 + $0x18] sm:$0xff] }
   0xc   :  { %165 = vmatprep.subr.mxu0 %v40_v10  ;;  %204 = vmatprep.subr.mxu1 %v40_v10  ;;  %v14_v31 = vld [vmem:[%s386_s1] sm:$0xff]  ;;  %v51_v33 = vld [vmem:[%s387_s0 + $0x28] sm:$0xff]  ;;  %v53_v37 = vld [vmem:[%s387_s0 + $0x38] sm:$0xff] }
   0xd   :  { %166 = vmatpush3.msra.mxu0 %v24_v11  ;;  %220 = vmatpush3.msra.mxu1 %v24_v11  ;;  %v46_v34 = vld [vmem:[%s387_s0] sm:$0xff]  ;;  %v48_v38 = vld [vmem:[%s387_s0 + $0x10] sm:$0xff] }
   0xe   :  { %167 = vmatprep.subr.mxu0 %v39_v12  ;;  %205 = vmatprep.subr.mxu1 %v39_v12  ;;  %v50_v35 = vld [vmem:[%s387_s0 + $0x20] sm:$0xff]  ;;  %v52_v39 = vld [vmem:[%s387_s0 + $0x30] sm:$0xff] }
   0xf   :  { %168 = vmatpush3.msra.mxu0 %v23_v13  ;;  %221 = vmatpush3.msra.mxu1 %v23_v13  ;;  %v154_v42 = vld [vmem:[%s388_s2] ss:$0 sm:$0xff] }
  0x10   :  { %169 = vmatprep.subr.mxu0 %v38_v14  ;;  %206 = vmatprep.subr.mxu1 %v38_v14 }
  0x11   :  { %170 = vmatpush3.msra.mxu0 %v22_v15  ;;  %222 = vmatpush3.msra.mxu1 %v22_v15 }
  0x12   :  { %171 = vmatprep.subr.mxu0 %v37_v16  ;;  %207 = vmatprep.subr.mxu1 %v37_v16 }
  0x13   :  { %172 = vmatpush3.msra.mxu0 %v21_v17  ;;  %223 = vmatpush3.msra.mxu1 %v21_v17 }
  0x14   :  { %173 = vmatprep.subr.mxu0 %v36_v18  ;;  %208 = vmatprep.subr.mxu1 %v36_v18 }
  0x15   :  { %174 = vmatpush3.msra.mxu0 %v20_v19  ;;  %224 = vmatpush3.msra.mxu1 %v20_v19 }
  0x16   :  { %175 = vmatprep.subr.mxu0 %v35_v20  ;;  %209 = vmatprep.subr.mxu1 %v35_v20 }
  0x17   :  { %176 = vmatpush3.msra.mxu0 %v19_v21  ;;  %225 = vmatpush3.msra.mxu1 %v19_v21 }
  0x18   :  { %177 = vmatprep.subr.mxu0 %v34_v22  ;;  %210 = vmatprep.subr.mxu1 %v34_v22 }
  0x19   :  { %178 = vmatpush3.msra.mxu0 %v18_v23  ;;  %226 = vmatpush3.msra.mxu1 %v18_v23 }
  0x1a   :  { %179 = vmatprep.subr.mxu0 %v33_v24  ;;  %211 = vmatprep.subr.mxu1 %v33_v24 }
  0x1b   :  { %180 = vmatpush3.msra.mxu0 %v17_v25  ;;  %227 = vmatpush3.msra.mxu1 %v17_v25 }
  0x1c   :  { %181 = vmatprep.subr.mxu0 %v32_v26  ;;  %212 = vmatprep.subr.mxu1 %v32_v26 }
  0x1d   :  { %182 = vmatpush3.msra.mxu0 %v16_v27  ;;  %228 = vmatpush3.msra.mxu1 %v16_v27 }
  0x1e   :  { %183 = vmatprep.subr.mxu0 %v31_v28  ;;  %213 = vmatprep.subr.mxu1 %v31_v28 }
  0x1f   :  { %184 = vmatpush3.msra.mxu0 %v15_v29  ;;  %229 = vmatpush3.msra.mxu1 %v15_v29 }
  0x20   :  { %185 = vmatprep.subr.mxu0 %v30_v30  ;;  %214 = vmatprep.subr.mxu1 %v30_v30 }
  0x21   :  { %186 = vmatpush3.msra.mxu0 %v14_v31  ;;  %230 = vmatpush3.msra.mxu1 %v14_v31 }
  0x22   :  { %125 = vmatprep.mubr.f32.mxu0 %v47_v32  ;;  %135 = vmatprep.mubr.f32.mxu1 %v51_v33 }
  0x23   :  { %126 = vmatmul.mubr.f32.vlgmr.msra.gmra.mxu0 %v46_v34  ;;  %136 = vmatmul.mubr.f32.vlgmr.msra.gmra.mxu1 %v50_v35 }
  0x24   :  { %130 = vmatprep.mubr.f32.mxu0 %v49_v36  ;;  %140 = vmatprep.mubr.f32.mxu1 %v53_v37 }
  0x27   :  { %131 = vmatmul.mubr.f32.gmra.mxu0 %v48_v38  ;;  %141 = vmatmul.mubr.f32.gmra.mxu1 %v52_v39 }
  0xe3   :  { %v187_v40 = vpop.f32.mrf.mxu0  ;;  %v193_v41 = vpop.f32.mrf.mxu1 }
  0xe5   :  { %v188_v43 = vpop.f32.mrf.mxu0  ;;  %v194_v44 = vpop.f32.mrf.mxu1 }
  0xe6   :  { %v189_v45 = vadd.f32 %v188_v43, %v187_v40  ;;  %v195_v46 = vadd.f32 %v194_v44, %v193_v41 }
  0xe7   :  { %v190_v47 = vpop.f32.mrf.mxu0  ;;  %v196_v48 = vpop.f32.mrf.mxu1 }
  0xe8   :  { %v128_v49 = vadd.f32 %v189_v45, %v154_v42  ;;  %v138_v50 = vadd.f32 %v195_v46, %v154_v42 }
  0xe9   :  { %v191_v51 = vpop.f32.mrf.mxu0  ;;  %v197_v52 = vpop.f32.mrf.mxu1 }
  0xea   :  { %146 = vst [vmem:[%s389_s3] sm:$0xff] %v128_v49  ;;  %148 = vst [vmem:[%s389_s3 + $0x10] sm:$0xff] %v138_v50  ;;  %v192_v53 = vadd.f32 %v191_v51, %v190_v47  ;;  %v198_v54 = vadd.f32 %v197_v52, %v196_v48 }
  0xec   :  { %v133_v55 = vadd.f32 %v192_v53, %v154_v42  ;;  %v143_v56 = vadd.f32 %v198_v54, %v154_v42 }
  0xee   :  { %147 = vst [vmem:[%s389_s3 + $0x8] sm:$0xff] %v133_v55  ;;  %149 = vst [vmem:[%s389_s3 + $0x18] sm:$0xff] %v143_v56 }

</bundles_post_ra>
